<compile_context>
chip_gen: v7x
topology: tpu7x:2x2x1
jax: 0.10.0
libtpu: 0.0.40
codegen_flags: <defaults>
</compile_context>

<pallas_src>
import functools

import jax
import jax.numpy as jnp
from jax.experimental import pallas as pl
from jax.experimental.pallas import tpu as pltpu

# ---- config (mirrors the PyTorch module's config) ----
IN_CHANNELS = 4
OUT_CHANNELS = 8
KERNEL_SIZE = 3       # odd -> 'same' padding is symmetric
POOL_K = 2
HIDDEN = 32
NUM_LAYERS = 2
BATCH = 2
SEQ_LEN = 16


# ----------------------------------------------------------------------------
# Single fused kernel
# ----------------------------------------------------------------------------
def cnn_lstm_kernel(xpad_ref, wconv_ref, bconv_ref,
                    wih0_ref, wihr_ref, whh_ref, bias_ref,
                    h0_ref, c0_ref, fcw_ref, fcb_ref,
                    out_ref, *, B, L, C_in, C_out, K, P, H, NL):
    T = B              # LSTM time axis (see layout note above)
    N = L // P         # LSTM batch axis

    # ---- Conv1d('same') as ONE im2col matmul, then tanh -> MaxPool1d -> ReLU ----
    xpad = xpad_ref[...]                                            # (B, L+K-1, C_in)
    xcol = jnp.concatenate([xpad[:, k:k + L, :] for k in range(K)],
                           axis=-1)                                 # (B, L, K*C_in)
    xcol = xcol.reshape(B * L, K * C_in)
    conv = jnp.dot(xcol, wconv_ref[...],
                   preferred_element_type=jnp.float32) + bconv_ref[...]
    y = jnp.tanh(conv).reshape(B, N, P, C_out)                      # split length dim
    y = jnp.max(y, axis=2)                                          # MaxPool1d(P)
    feat = jnp.maximum(y, 0.0).reshape(T * N, C_out)                # ReLU; row = t*N + n

    # ---- multi-layer LSTM with fused gates (one (N,H)x(H,4H) matmul per step) ----
    layer_in = feat                                                 # (T*N, in_l)
    for l in range(NL):                                             # static unroll
        wih = wih0_ref[...] if l == 0 else wihr_ref[l - 1]          # (in_l, 4H)
        # Input projection + (b_ih + b_hh) for ALL timesteps at once: off the
        # serial h->h dependence chain.
        proj = jnp.dot(layer_in, wih,
                       preferred_element_type=jnp.float32) + bias_ref[l]  # (T*N, 4H)
        whh_l = whh_ref[l]                                          # (H, 4H)
        h = h0_ref[l]                                               # (N, H)
        c = c0_ref[l]
        is_last = (l == NL - 1)
        outs = []
        # T is tiny here (= BATCH).  For large T, switch this to lax.fori_loop with
        # (h, c) carries to bound vreg live ranges.
        for t in range(T):
            gates = proj[t * N:(t + 1) * N, :] + jnp.dot(
                h, whh_l, preferred_element_type=jnp.float32)       # (N, 4H)
            i = jax.nn.sigmoid(gates[:, 0 * H:1 * H])               # PyTorch order i,f,g,o
            f = jax.nn.sigmoid(gates[:, 1 * H:2 * H])
            g = jnp.tanh(gates[:, 2 * H:3 * H])
            o = jax.nn.sigmoid(gates[:, 3 * H:4 * H])
            c = f * c + i * g
            h = o * jnp.tanh(c)
            # Only the n = N-1 row of the last layer is consumed downstream
            # (x[:, -1, :]); earlier layers feed the next layer and need all rows.
            outs.append(h[N - 1:N, :] if is_last else h)
        layer_in = jnp.concatenate(outs, axis=0)    # (T,H) if last layer else (T*N,H)

    # ---- tanh -> Linear(H, 1) -> sigmoid on the stacked (T, H) last-row hiddens ----
    logit = jnp.sum(jnp.tanh(layer_in) * fcw_ref[...], axis=-1,
                    keepdims=True) + fcb_ref[0, 0]                  # (T, 1)
    out_ref[...] = jax.nn.sigmoid(logit)


# ----------------------------------------------------------------------------
# One-time weight packing (hoisted OUT of the per-forward hot path)
# ----------------------------------------------------------------------------
def prepare_params(params):
    K, H, NL = KERNEL_SIZE, HIDDEN, NUM_LAYERS
    C_in, C_out = IN_CHANNELS, OUT_CHANNELS
    packed = {}
    # Conv1d weight (C_out, C_in, K) -> im2col layout (K*C_in, C_out); bias (1, C_out).
    packed["wconv"] = jnp.transpose(params["conv_w"], (2, 1, 0)).reshape(K * C_in, C_out)
    packed["bconv"] = params["conv_b"].reshape(1, C_out)
    # LSTM weights in fused-gate layout.  PyTorch W_ih/W_hh are (4H, in) with row blocks
    # [i; f; g; o]; transposing gives (in, 4H) with the gates as column blocks.
    packed["wih0"] = params["lstm_wih_0"].T                                        # (C_out, 4H)
    packed["wihr"] = jnp.stack([params[f"lstm_wih_{l}"].T for l in range(1, NL)])  # (NL-1, H, 4H)
    packed["whh"] = jnp.stack([params[f"lstm_whh_{l}"].T for l in range(NL)])      # (NL, H, 4H)
    packed["bias"] = jnp.stack(
        [(params[f"lstm_bih_{l}"] + params[f"lstm_bhh_{l}"]).reshape(1, 4 * H)
         for l in range(NL)])                                                      # (NL, 1, 4H)
    packed["fcw"] = params["fc_w"].reshape(1, H)
    packed["fcb"] = params["fc_b"].reshape(1, 1)
    packed["h0"] = params["h0"]
    packed["c0"] = params["c0"]
    return packed


# ----------------------------------------------------------------------------
# Forward: jnp.pad(x) + one fused pallas_call
# ----------------------------------------------------------------------------
def cnn_lstm_forward(x, packed):
    B, L, C_in = x.shape
    K, P, H, NL, C_out = KERNEL_SIZE, POOL_K, HIDDEN, NUM_LAYERS, OUT_CHANNELS

    pad_l = (K - 1) // 2
    pad_r = K - 1 - pad_l
    xpad = jnp.pad(x, ((0, 0), (pad_l, pad_r), (0, 0)))

    vmem = pl.BlockSpec(memory_space=pltpu.MemorySpace.VMEM)
    smem = pl.BlockSpec(memory_space=pltpu.MemorySpace.SMEM)

    kernel = functools.partial(cnn_lstm_kernel, B=B, L=L, C_in=C_in,
                               C_out=C_out, K=K, P=P, H=H, NL=NL)

    return pl.pallas_call(
        kernel,
        out_shape=jax.ShapeDtypeStruct((B, 1), jnp.float32),
        in_specs=[vmem] * 10 + [smem],
        out_specs=vmem,
    )(xpad, packed["wconv"], packed["bconv"],
      packed["wih0"], packed["wihr"], packed["whh"], packed["bias"],
      packed["h0"], packed["c0"], packed["fcw"], packed["fcb"])


# ----------------------------------------------------------------------------
# Deterministic parameter initialization (shapes follow the module's __init__)
# ----------------------------------------------------------------------------
def init_params(key):
    keys = jax.random.split(key, 16)
    p = {}
    p["conv_w"] = 0.3 * jax.random.normal(keys[0], (OUT_CHANNELS, IN_CHANNELS, KERNEL_SIZE), jnp.float32)
    p["conv_b"] = 0.1 * jax.random.normal(keys[1], (OUT_CHANNELS,), jnp.float32)
    ki = 2
    for l in range(NUM_LAYERS):
        in_l = OUT_CHANNELS if l == 0 else HIDDEN
        p[f"lstm_wih_{l}"] = 0.2 * jax.random.normal(keys[ki], (4 * HIDDEN, in_l), jnp.float32); ki += 1
        p[f"lstm_whh_{l}"] = 0.2 * jax.random.normal(keys[ki], (4 * HIDDEN, HIDDEN), jnp.float32); ki += 1
        p[f"lstm_bih_{l}"] = 0.1 * jax.random.normal(keys[ki], (4 * HIDDEN,), jnp.float32); ki += 1
        p[f"lstm_bhh_{l}"] = 0.1 * jax.random.normal(keys[ki], (4 * HIDDEN,), jnp.float32); ki += 1
    p["fc_w"] = 0.2 * jax.random.normal(keys[ki], (1, HIDDEN), jnp.float32); ki += 1
    p["fc_b"] = 0.1 * jax.random.normal(keys[ki], (1,), jnp.float32); ki += 1
    # TODO(synk): get_hidden() draws torch.randn each forward call; here the initial
    # (h0, c0) are fixed deterministic draws (no clean in-kernel equivalent of that RNG).
    Lp = SEQ_LEN // POOL_K
    p["h0"] = jax.random.normal(keys[ki], (NUM_LAYERS, Lp, HIDDEN), jnp.float32); ki += 1
    p["c0"] = jax.random.normal(keys[ki], (NUM_LAYERS, Lp, HIDDEN), jnp.float32)
    return p


if __name__ == "__main__":
    key = jax.random.PRNGKey(0)
    kx, kp = jax.random.split(key)
    x = jax.random.normal(kx, (BATCH, SEQ_LEN, IN_CHANNELS), jnp.float32)
    params = init_params(kp)

    packed = prepare_params(params)          # one-time packing, off the hot path
    fwd = jax.jit(cnn_lstm_forward)

    out = fwd(x, packed)
    jax.block_until_ready(out)
    assert out.shape == (BATCH, 1) and out.dtype == jnp.float32
    print("KERNEL_OK")
</pallas_src>

<mosaic_0001>
module attributes {stable_mosaic.version = 11 : i64} {
  func.func @cnn_lstm_kernel(%arg0: memref<2x18x4xf32, #tpu.memory_space<vmem>>, %arg1: memref<12x8xf32, #tpu.memory_space<vmem>>, %arg2: memref<1x8xf32, #tpu.memory_space<vmem>>, %arg3: memref<8x128xf32, #tpu.memory_space<vmem>>, %arg4: memref<1x32x128xf32, #tpu.memory_space<vmem>>, %arg5: memref<2x32x128xf32, #tpu.memory_space<vmem>>, %arg6: memref<2x1x128xf32, #tpu.memory_space<vmem>>, %arg7: memref<2x8x32xf32, #tpu.memory_space<vmem>>, %arg8: memref<2x8x32xf32, #tpu.memory_space<vmem>>, %arg9: memref<1x32xf32, #tpu.memory_space<vmem>>, %arg10: memref<1x1xf32, #tpu.memory_space<smem>>, %arg11: memref<2x1xf32, #tpu.memory_space<vmem>>) attributes {dimension_semantics = [], scalar_prefetch = 0 : i64, scratch_operands = 0 : i64, tpu.core_type = #tpu.core_type<tc>} {
    %c0 = arith.constant 0 : index
    %c0_0 = arith.constant 0 : index
    %c0_1 = arith.constant 0 : index
    %0 = vector.load %arg0[%c0, %c0_0, %c0_1] : memref<2x18x4xf32, #tpu.memory_space<vmem>>, vector<2x18x4xf32>
    %1 = vector.extract_strided_slice %0 {offsets = [0, 0, 0], sizes = [2, 16, 4], strides = [1, 1, 1]} : vector<2x18x4xf32> to vector<2x16x4xf32>
    %2 = vector.extract_strided_slice %0 {offsets = [0, 1, 0], sizes = [2, 16, 4], strides = [1, 1, 1]} : vector<2x18x4xf32> to vector<2x16x4xf32>
    %3 = vector.extract_strided_slice %0 {offsets = [0, 2, 0], sizes = [2, 16, 4], strides = [1, 1, 1]} : vector<2x18x4xf32> to vector<2x16x4xf32>
    %4 = tpu.concatenate %1, %2, %3 in 2 : vector<2x16x4xf32>, vector<2x16x4xf32>, vector<2x16x4xf32> -> vector<2x16x12xf32>
    %5 = vector.shape_cast %4 : vector<2x16x12xf32> to vector<32x12xf32>
    %c0_2 = arith.constant 0 : index
    %c0_3 = arith.constant 0 : index
    %6 = vector.load %arg1[%c0_2, %c0_3] : memref<12x8xf32, #tpu.memory_space<vmem>>, vector<12x8xf32>
    %cst = arith.constant dense<0.000000e+00> : vector<32x8xf32>
    %7 = tpu.matmul %5, %6, %cst {dimension_numbers = #tpu.dot_dimension_numbers<[1], [0], [0], [1], [0, 0, 1, 1], [], []>} : vector<32x12xf32>, vector<12x8xf32>, vector<32x8xf32> -> vector<32x8xf32>
    %c0_4 = arith.constant 0 : index
    %c0_5 = arith.constant 0 : index
    %8 = vector.load %arg2[%c0_4, %c0_5] : memref<1x8xf32, #tpu.memory_space<vmem>>, vector<1x8xf32>
    %9 = vector.broadcast %8 : vector<1x8xf32> to vector<32x8xf32>
    %10 = arith.addf %7, %9 : vector<32x8xf32>
    %11 = math.tanh %10 : vector<32x8xf32>
    %12 = vector.shape_cast %11 : vector<32x8xf32> to vector<2x8x2x8xf32>
    %cst_6 = arith.constant dense<0xFF800000> : vector<2x8x8xf32>
    %13 = vector.multi_reduction <maximumf>, %12, %cst_6 [2] : vector<2x8x2x8xf32> to vector<2x8x8xf32>
    %cst_7 = arith.constant 0.000000e+00 : f32
    %14 = vector.broadcast %cst_7 : f32 to vector<2x8x8xf32>
    %15 = arith.maximumf %13, %14 : vector<2x8x8xf32>
    %16 = vector.shape_cast %15 : vector<2x8x8xf32> to vector<16x8xf32>
    %c0_8 = arith.constant 0 : index
    %c0_9 = arith.constant 0 : index
    %17 = vector.load %arg3[%c0_8, %c0_9] : memref<8x128xf32, #tpu.memory_space<vmem>>, vector<8x128xf32>
    %cst_10 = arith.constant dense<0.000000e+00> : vector<16x128xf32>
    %18 = tpu.matmul %16, %17, %cst_10 {dimension_numbers = #tpu.dot_dimension_numbers<[1], [0], [0], [1], [0, 0, 1, 1], [], []>} : vector<16x8xf32>, vector<8x128xf32>, vector<16x128xf32> -> vector<16x128xf32>
    %c0_11 = arith.constant 0 : index
    %c0_12 = arith.constant 0 : index
    %c0_13 = arith.constant 0 : index
    %19 = vector.load %arg6[%c0_11, %c0_12, %c0_13] : memref<2x1x128xf32, #tpu.memory_space<vmem>>, vector<1x1x128xf32>
    %20 = vector.shape_cast %19 : vector<1x1x128xf32> to vector<1x128xf32>
    %21 = vector.broadcast %20 : vector<1x128xf32> to vector<16x128xf32>
    %22 = arith.addf %18, %21 : vector<16x128xf32>
    %c0_14 = arith.constant 0 : index
    %c0_15 = arith.constant 0 : index
    %c0_16 = arith.constant 0 : index
    %23 = vector.load %arg5[%c0_14, %c0_15, %c0_16] : memref<2x32x128xf32, #tpu.memory_space<vmem>>, vector<1x32x128xf32>
    %24 = vector.shape_cast %23 : vector<1x32x128xf32> to vector<32x128xf32>
    %c0_17 = arith.constant 0 : index
    %c0_18 = arith.constant 0 : index
    %c0_19 = arith.constant 0 : index
    %25 = vector.load %arg7[%c0_17, %c0_18, %c0_19] : memref<2x8x32xf32, #tpu.memory_space<vmem>>, vector<1x8x32xf32>
    %26 = vector.shape_cast %25 : vector<1x8x32xf32> to vector<8x32xf32>
    %c0_20 = arith.constant 0 : index
    %c0_21 = arith.constant 0 : index
    %c0_22 = arith.constant 0 : index
    %27 = vector.load %arg8[%c0_20, %c0_21, %c0_22] : memref<2x8x32xf32, #tpu.memory_space<vmem>>, vector<1x8x32xf32>
    %28 = vector.shape_cast %27 : vector<1x8x32xf32> to vector<8x32xf32>
    %29 = vector.extract_strided_slice %22 {offsets = [0, 0], sizes = [8, 128], strides = [1, 1]} : vector<16x128xf32> to vector<8x128xf32>
    %cst_23 = arith.constant dense<0.000000e+00> : vector<8x128xf32>
    %30 = tpu.matmul %26, %24, %cst_23 {dimension_numbers = #tpu.dot_dimension_numbers<[1], [0], [0], [1], [0, 0, 1, 1], [], []>} : vector<8x32xf32>, vector<32x128xf32>, vector<8x128xf32> -> vector<8x128xf32>
    %31 = arith.addf %29, %30 : vector<8x128xf32>
    %32 = vector.extract_strided_slice %31 {offsets = [0, 0], sizes = [8, 32], strides = [1, 1]} : vector<8x128xf32> to vector<8x32xf32>
    %33 = arith.negf %32 : vector<8x32xf32>
    %34 = math.exp %33 : vector<8x32xf32>
    %cst_24 = arith.constant 1.000000e+00 : f32
    %35 = vector.broadcast %cst_24 : f32 to vector<8x32xf32>
    %36 = arith.addf %35, %34 : vector<8x32xf32>
    %37 = arith.divf %35, %36 : vector<8x32xf32>
    %38 = vector.extract_strided_slice %31 {offsets = [0, 32], sizes = [8, 32], strides = [1, 1]} : vector<8x128xf32> to vector<8x32xf32>
    %39 = arith.negf %38 : vector<8x32xf32>
    %40 = math.exp %39 : vector<8x32xf32>
    %cst_25 = arith.constant 1.000000e+00 : f32
    %41 = vector.broadcast %cst_25 : f32 to vector<8x32xf32>
    %42 = arith.addf %41, %40 : vector<8x32xf32>
    %43 = arith.divf %41, %42 : vector<8x32xf32>
    %44 = vector.extract_strided_slice %31 {offsets = [0, 64], sizes = [8, 32], strides = [1, 1]} : vector<8x128xf32> to vector<8x32xf32>
    %45 = math.tanh %44 : vector<8x32xf32>
    %46 = vector.extract_strided_slice %31 {offsets = [0, 96], sizes = [8, 32], strides = [1, 1]} : vector<8x128xf32> to vector<8x32xf32>
    %47 = arith.negf %46 : vector<8x32xf32>
    %48 = math.exp %47 : vector<8x32xf32>
    %cst_26 = arith.constant 1.000000e+00 : f32
    %49 = vector.broadcast %cst_26 : f32 to vector<8x32xf32>
    %50 = arith.addf %49, %48 : vector<8x32xf32>
    %51 = arith.divf %49, %50 : vector<8x32xf32>
    %52 = arith.mulf %43, %28 : vector<8x32xf32>
    %53 = arith.mulf %37, %45 : vector<8x32xf32>
    %54 = arith.addf %52, %53 : vector<8x32xf32>
    %55 = math.tanh %54 : vector<8x32xf32>
    %56 = arith.mulf %51, %55 : vector<8x32xf32>
    %57 = vector.extract_strided_slice %22 {offsets = [8, 0], sizes = [8, 128], strides = [1, 1]} : vector<16x128xf32> to vector<8x128xf32>
    %cst_27 = arith.constant dense<0.000000e+00> : vector<8x128xf32>
    %58 = tpu.matmul %56, %24, %cst_27 {dimension_numbers = #tpu.dot_dimension_numbers<[1], [0], [0], [1], [0, 0, 1, 1], [], []>} : vector<8x32xf32>, vector<32x128xf32>, vector<8x128xf32> -> vector<8x128xf32>
    %59 = arith.addf %57, %58 : vector<8x128xf32>
    %60 = vector.extract_strided_slice %59 {offsets = [0, 0], sizes = [8, 32], strides = [1, 1]} : vector<8x128xf32> to vector<8x32xf32>
    %61 = arith.negf %60 : vector<8x32xf32>
    %62 = math.exp %61 : vector<8x32xf32>
    %cst_28 = arith.constant 1.000000e+00 : f32
    %63 = vector.broadcast %cst_28 : f32 to vector<8x32xf32>
    %64 = arith.addf %63, %62 : vector<8x32xf32>
    %65 = arith.divf %63, %64 : vector<8x32xf32>
    %66 = vector.extract_strided_slice %59 {offsets = [0, 32], sizes = [8, 32], strides = [1, 1]} : vector<8x128xf32> to vector<8x32xf32>
    %67 = arith.negf %66 : vector<8x32xf32>
    %68 = math.exp %67 : vector<8x32xf32>
    %cst_29 = arith.constant 1.000000e+00 : f32
    %69 = vector.broadcast %cst_29 : f32 to vector<8x32xf32>
    %70 = arith.addf %69, %68 : vector<8x32xf32>
    %71 = arith.divf %69, %70 : vector<8x32xf32>
    %72 = vector.extract_strided_slice %59 {offsets = [0, 64], sizes = [8, 32], strides = [1, 1]} : vector<8x128xf32> to vector<8x32xf32>
    %73 = math.tanh %72 : vector<8x32xf32>
    %74 = vector.extract_strided_slice %59 {offsets = [0, 96], sizes = [8, 32], strides = [1, 1]} : vector<8x128xf32> to vector<8x32xf32>
    %75 = arith.negf %74 : vector<8x32xf32>
    %76 = math.exp %75 : vector<8x32xf32>
    %cst_30 = arith.constant 1.000000e+00 : f32
    %77 = vector.broadcast %cst_30 : f32 to vector<8x32xf32>
    %78 = arith.addf %77, %76 : vector<8x32xf32>
    %79 = arith.divf %77, %78 : vector<8x32xf32>
    %80 = arith.mulf %71, %54 : vector<8x32xf32>
    %81 = arith.mulf %65, %73 : vector<8x32xf32>
    %82 = arith.addf %80, %81 : vector<8x32xf32>
    %83 = math.tanh %82 : vector<8x32xf32>
    %84 = arith.mulf %79, %83 : vector<8x32xf32>
    %85 = tpu.concatenate %56, %84 in 0 : vector<8x32xf32>, vector<8x32xf32> -> vector<16x32xf32>
    %c0_31 = arith.constant 0 : index
    %c0_32 = arith.constant 0 : index
    %c0_33 = arith.constant 0 : index
    %86 = vector.load %arg4[%c0_31, %c0_32, %c0_33] : memref<1x32x128xf32, #tpu.memory_space<vmem>>, vector<1x32x128xf32>
    %87 = vector.shape_cast %86 : vector<1x32x128xf32> to vector<32x128xf32>
    %cst_34 = arith.constant dense<0.000000e+00> : vector<16x128xf32>
    %88 = tpu.matmul %85, %87, %cst_34 {dimension_numbers = #tpu.dot_dimension_numbers<[1], [0], [0], [1], [0, 0, 1, 1], [], []>} : vector<16x32xf32>, vector<32x128xf32>, vector<16x128xf32> -> vector<16x128xf32>
    %c1 = arith.constant 1 : index
    %c0_35 = arith.constant 0 : index
    %c0_36 = arith.constant 0 : index
    %89 = vector.load %arg6[%c1, %c0_35, %c0_36] : memref<2x1x128xf32, #tpu.memory_space<vmem>>, vector<1x1x128xf32>
    %90 = vector.shape_cast %89 : vector<1x1x128xf32> to vector<1x128xf32>
    %91 = vector.broadcast %90 : vector<1x128xf32> to vector<16x128xf32>
    %92 = arith.addf %88, %91 : vector<16x128xf32>
    %c1_37 = arith.constant 1 : index
    %c0_38 = arith.constant 0 : index
    %c0_39 = arith.constant 0 : index
    %93 = vector.load %arg5[%c1_37, %c0_38, %c0_39] : memref<2x32x128xf32, #tpu.memory_space<vmem>>, vector<1x32x128xf32>
    %94 = vector.shape_cast %93 : vector<1x32x128xf32> to vector<32x128xf32>
    %c1_40 = arith.constant 1 : index
    %c0_41 = arith.constant 0 : index
    %c0_42 = arith.constant 0 : index
    %95 = vector.load %arg7[%c1_40, %c0_41, %c0_42] : memref<2x8x32xf32, #tpu.memory_space<vmem>>, vector<1x8x32xf32>
    %96 = vector.shape_cast %95 : vector<1x8x32xf32> to vector<8x32xf32>
    %c1_43 = arith.constant 1 : index
    %c0_44 = arith.constant 0 : index
    %c0_45 = arith.constant 0 : index
    %97 = vector.load %arg8[%c1_43, %c0_44, %c0_45] : memref<2x8x32xf32, #tpu.memory_space<vmem>>, vector<1x8x32xf32>
    %98 = vector.shape_cast %97 : vector<1x8x32xf32> to vector<8x32xf32>
    %99 = vector.extract_strided_slice %92 {offsets = [0, 0], sizes = [8, 128], strides = [1, 1]} : vector<16x128xf32> to vector<8x128xf32>
    %cst_46 = arith.constant dense<0.000000e+00> : vector<8x128xf32>
    %100 = tpu.matmul %96, %94, %cst_46 {dimension_numbers = #tpu.dot_dimension_numbers<[1], [0], [0], [1], [0, 0, 1, 1], [], []>} : vector<8x32xf32>, vector<32x128xf32>, vector<8x128xf32> -> vector<8x128xf32>
    %101 = arith.addf %99, %100 : vector<8x128xf32>
    %102 = vector.extract_strided_slice %101 {offsets = [0, 0], sizes = [8, 32], strides = [1, 1]} : vector<8x128xf32> to vector<8x32xf32>
    %103 = arith.negf %102 : vector<8x32xf32>
    %104 = math.exp %103 : vector<8x32xf32>
    %cst_47 = arith.constant 1.000000e+00 : f32
    %105 = vector.broadcast %cst_47 : f32 to vector<8x32xf32>
    %106 = arith.addf %105, %104 : vector<8x32xf32>
    %107 = arith.divf %105, %106 : vector<8x32xf32>
    %108 = vector.extract_strided_slice %101 {offsets = [0, 32], sizes = [8, 32], strides = [1, 1]} : vector<8x128xf32> to vector<8x32xf32>
    %109 = arith.negf %108 : vector<8x32xf32>
    %110 = math.exp %109 : vector<8x32xf32>
    %cst_48 = arith.constant 1.000000e+00 : f32
    %111 = vector.broadcast %cst_48 : f32 to vector<8x32xf32>
    %112 = arith.addf %111, %110 : vector<8x32xf32>
    %113 = arith.divf %111, %112 : vector<8x32xf32>
    %114 = vector.extract_strided_slice %101 {offsets = [0, 64], sizes = [8, 32], strides = [1, 1]} : vector<8x128xf32> to vector<8x32xf32>
    %115 = math.tanh %114 : vector<8x32xf32>
    %116 = vector.extract_strided_slice %101 {offsets = [0, 96], sizes = [8, 32], strides = [1, 1]} : vector<8x128xf32> to vector<8x32xf32>
    %117 = arith.negf %116 : vector<8x32xf32>
    %118 = math.exp %117 : vector<8x32xf32>
    %cst_49 = arith.constant 1.000000e+00 : f32
    %119 = vector.broadcast %cst_49 : f32 to vector<8x32xf32>
    %120 = arith.addf %119, %118 : vector<8x32xf32>
    %121 = arith.divf %119, %120 : vector<8x32xf32>
    %122 = arith.mulf %113, %98 : vector<8x32xf32>
    %123 = arith.mulf %107, %115 : vector<8x32xf32>
    %124 = arith.addf %122, %123 : vector<8x32xf32>
    %125 = math.tanh %124 : vector<8x32xf32>
    %126 = arith.mulf %121, %125 : vector<8x32xf32>
    %127 = vector.extract_strided_slice %126 {offsets = [7, 0], sizes = [1, 32], strides = [1, 1]} : vector<8x32xf32> to vector<1x32xf32>
    %128 = vector.extract_strided_slice %92 {offsets = [8, 0], sizes = [8, 128], strides = [1, 1]} : vector<16x128xf32> to vector<8x128xf32>
    %cst_50 = arith.constant dense<0.000000e+00> : vector<8x128xf32>
    %129 = tpu.matmul %126, %94, %cst_50 {dimension_numbers = #tpu.dot_dimension_numbers<[1], [0], [0], [1], [0, 0, 1, 1], [], []>} : vector<8x32xf32>, vector<32x128xf32>, vector<8x128xf32> -> vector<8x128xf32>
    %130 = arith.addf %128, %129 : vector<8x128xf32>
    %131 = vector.extract_strided_slice %130 {offsets = [0, 0], sizes = [8, 32], strides = [1, 1]} : vector<8x128xf32> to vector<8x32xf32>
    %132 = arith.negf %131 : vector<8x32xf32>
    %133 = math.exp %132 : vector<8x32xf32>
    %cst_51 = arith.constant 1.000000e+00 : f32
    %134 = vector.broadcast %cst_51 : f32 to vector<8x32xf32>
    %135 = arith.addf %134, %133 : vector<8x32xf32>
    %136 = arith.divf %134, %135 : vector<8x32xf32>
    %137 = vector.extract_strided_slice %130 {offsets = [0, 32], sizes = [8, 32], strides = [1, 1]} : vector<8x128xf32> to vector<8x32xf32>
    %138 = arith.negf %137 : vector<8x32xf32>
    %139 = math.exp %138 : vector<8x32xf32>
    %cst_52 = arith.constant 1.000000e+00 : f32
    %140 = vector.broadcast %cst_52 : f32 to vector<8x32xf32>
    %141 = arith.addf %140, %139 : vector<8x32xf32>
    %142 = arith.divf %140, %141 : vector<8x32xf32>
    %143 = vector.extract_strided_slice %130 {offsets = [0, 64], sizes = [8, 32], strides = [1, 1]} : vector<8x128xf32> to vector<8x32xf32>
    %144 = math.tanh %143 : vector<8x32xf32>
    %145 = vector.extract_strided_slice %130 {offsets = [0, 96], sizes = [8, 32], strides = [1, 1]} : vector<8x128xf32> to vector<8x32xf32>
    %146 = arith.negf %145 : vector<8x32xf32>
    %147 = math.exp %146 : vector<8x32xf32>
    %cst_53 = arith.constant 1.000000e+00 : f32
    %148 = vector.broadcast %cst_53 : f32 to vector<8x32xf32>
    %149 = arith.addf %148, %147 : vector<8x32xf32>
    %150 = arith.divf %148, %149 : vector<8x32xf32>
    %151 = arith.mulf %142, %124 : vector<8x32xf32>
    %152 = arith.mulf %136, %144 : vector<8x32xf32>
    %153 = arith.addf %151, %152 : vector<8x32xf32>
    %154 = math.tanh %153 : vector<8x32xf32>
    %155 = arith.mulf %150, %154 : vector<8x32xf32>
    %156 = vector.extract_strided_slice %155 {offsets = [7, 0], sizes = [1, 32], strides = [1, 1]} : vector<8x32xf32> to vector<1x32xf32>
    %157 = tpu.concatenate %127, %156 in 0 : vector<1x32xf32>, vector<1x32xf32> -> vector<2x32xf32>
    %158 = math.tanh %157 : vector<2x32xf32>
    %c0_54 = arith.constant 0 : index
    %c0_55 = arith.constant 0 : index
    %159 = vector.load %arg9[%c0_54, %c0_55] : memref<1x32xf32, #tpu.memory_space<vmem>>, vector<1x32xf32>
    %160 = vector.broadcast %159 : vector<1x32xf32> to vector<2x32xf32>
    %161 = arith.mulf %158, %160 : vector<2x32xf32>
    %cst_56 = arith.constant dense<0.000000e+00> : vector<2xf32>
    %162 = vector.multi_reduction <add>, %161, %cst_56 [1] : vector<2x32xf32> to vector<2xf32>
    %163 = vector.shape_cast %162 : vector<2xf32> to vector<2x1xf32>
    %c0_57 = arith.constant 0 : index
    %c0_58 = arith.constant 0 : index
    %164 = memref.load %arg10[%c0_57, %c0_58] : memref<1x1xf32, #tpu.memory_space<smem>>
    %165 = vector.broadcast %164 : f32 to vector<2x1xf32>
    %166 = arith.addf %163, %165 : vector<2x1xf32>
    %167 = arith.negf %166 : vector<2x1xf32>
    %168 = math.exp %167 : vector<2x1xf32>
    %cst_59 = arith.constant 1.000000e+00 : f32
    %169 = vector.broadcast %cst_59 : f32 to vector<2x1xf32>
    %170 = arith.addf %169, %168 : vector<2x1xf32>
    %171 = arith.divf %169, %170 : vector<2x1xf32>
    %c0_60 = arith.constant 0 : index
    %c0_61 = arith.constant 0 : index
    %172 = vector.load %arg11[%c0_60, %c0_61] : memref<2x1xf32, #tpu.memory_space<vmem>>, vector<2x1xf32>
    tpu.vector_store %arg11[%c0_60, %c0_61], %171 {strides = array<i32>} : memref<2x1xf32, #tpu.memory_space<vmem>>, vector<2x1xf32>,
    return
  }
}

</mosaic_0001>

<bundles_post_ra>
// kernel: cnn_lstm_forward.1
= control target key start
LH: loop header
LB: loop body
LE: loop exit
PB: predicated region body
PF: predicated region fallthrough
CT: control target
= control target key end

     0   :  { %vm74_vm0 = vcmask 1045504   ;;  %vm51_vm1 = vcmask 1046528   ;;  %vm129_vm2 = vcmask 1043456   ;;  %s1344_s14 = smov 8   ;;  %s1345_s15 = smov 4   ;;  %vm1346_vm3 = vmmov 1   ;;  %s1641_s0 = inlined_call_operand.vmem [shape: f32[2,18,4], index: 0, kind: input, shape index: {}]   ;;  %s1642_s1 = inlined_call_operand.vmem [shape: f32[12,8], index: 1, kind: input, shape index: {}]   ;;  %s1643_s3 = inlined_call_operand.vmem [shape: f32[8,128], index: 3, kind: input, shape index: {}]   ;;  %s1644_s5 = inlined_call_operand.vmem [shape: f32[2,32,128], index: 5, kind: input, shape index: {}]   ;;  %s1645_s8 = inlined_call_operand.vmem [shape: f32[2,8,32], index: 8, kind: input, shape index: {}]   ;;  %s1646_s2 = inlined_call_operand.vmem [shape: f32[1,8], index: 2, kind: input, shape index: {}]   ;;  %s1647_s7 = inlined_call_operand.vmem [shape: f32[2,8,32], index: 7, kind: input, shape index: {}]   ;;  %s1648_s6 = inlined_call_operand.vmem [shape: f32[2,1,128], index: 6, kind: input, shape index: {}]   ;;  %s1649_s4 = inlined_call_operand.vmem [shape: f32[1,32,128], index: 4, kind: input, shape index: {}]   ;;  %s1650_s9 = inlined_call_operand.vmem [shape: f32[1,32], index: 9, kind: input, shape index: {}]   ;;  %s1651_s10 = inlined_call_operand.<no memory space> [shape: f32[1,1], index: 10, kind: input, shape index: {}]   ;;  %s1652_s11 = inlined_call_operand.vmem [shape: f32[2,1], index: 11, kind: output, shape index: {}]  }
   0x1   :  { %v39_v0 = vld [vmem:[%s1641_s0] sm:$0xff]  ;;  %v40_v1 = vld [vmem:[%s1641_s0 + $0x8] sm:$0xff]  ;;  %v41_v2 = vld [vmem:[%s1641_s0 + $0x10] sm:$0x3]  ;;  %vm97_vm5 = vcmask 31744   ;;  %vm102_vm6 = vcmask 64512   ;;  %v230_v61 = vlaneseq }
   0x2   :  { %v75_v3 = vrot.slane %v39_v0, 2  ;;  %v76_v4 = vrot.slane %v40_v1, 2  ;;  %v52_v5 = vrot.slane %v39_v0, 1  ;;  %v53_v6 = vrot.slane %v40_v1, 1  ;;  %v43_v7 = vld [vmem:[%s1641_s0 + $0x20] sm:$0xff]  ;;  %v42_v8 = vld [vmem:[%s1641_s0 + $0x18] sm:$0xff]  ;;  %vm1251_vm4 = vmpackc.low %vm129_vm2, %vm1346_vm3 }
   0x3   :  { %v78_v9 = vrot.slane %v41_v2, 2  ;;  %v55_v10 = vrot.slane %v41_v2, 1  ;;  %v44_v11 = vld [vmem:[%s1641_s0 + $0x28] sm:$0x3]  ;;  %v107_v14 = vld [vmem:[%s1642_s1] sm:$0xff]  ;;  %v58_v16 = vrot.slane %v43_v7, 1 }
   0x4   :  { %v77_v12 = vsel %vm74_vm0, %v75_v3, %v76_v4  ;;  %v54_v13 = vsel %vm51_vm1, %v52_v5, %v53_v6  ;;  %v108_v15 = vld [vmem:[%s1642_s1 + $0x8] sm:$0xf]  ;;  %v57_v17 = vrot.slane %v42_v8, 1  ;;  %v60_v20 = vrot.slane %v44_v11, 1  ;;  %v439_v45 = vld [vmem:[%s1643_s3] sm:$0xff]  ;;  %v565_v50 = vld [vmem:[%s1644_s5 + $0x10] sm:$0xff] }
   0x5   :  { %85 = vrot.lane.b32.xlu1 %v77_v12, %s1344_s14  ;;  %62 = vrot.lane.b32.xlu0 %v54_v13, %s1345_s15  ;;  %v79_v18 = vsel %vm74_vm0, %v76_v4, %v78_v9  ;;  %v56_v19 = vsel %vm51_vm1, %v53_v6, %v55_v10  ;;  %v1250_v21 = vpack.c.bf16 %v108_v15, %v107_v14  ;;  %v81_v22 = vrot.slane %v43_v7, 2  ;;  %v563_v47 = vld [vmem:[%s1644_s5] sm:$0xff]  ;;  %v564_v48 = vld [vmem:[%s1644_s5 + $0x8] sm:$0xff]  ;;  %s1350_s25 = smov 32   ;;  %s1352_s12 = smov 64  }
   0x6   :  { %v61_v23 = vsel %vm51_vm1, %v58_v16, %v60_v20  ;;  %v59_v24 = vsel %vm51_vm1, %v57_v17, %v58_v16  ;;  %v83_v25 = vrot.slane %v44_v11, 2  ;;  %v80_v26 = vrot.slane %v42_v8, 2  ;;  %1190 = vmatprep.subr.mxu1 %v439_v45  ;;  %v566_v51 = vld [vmem:[%s1644_s5 + $0x18] sm:$0xff]  ;;  %v568_v54 = vld [vmem:[%s1645_s8] sm:$0xff]  ;;  %s1353_s29 = smov 96  }
   0x7   :  { %1252 = vmatprep.subr.msk.bf16.mxu0 %vm1251_vm4, %v1250_v21  ;;  %vm116_vm7 = vcmask 97280   ;;  %v1347_v46 = vmov 0.0|0.0   ;;  %1191 = vmatpush3.msra.mxu1 %v439_v45  ;;  %v1470_v49 = vpack.c.bf16 %v564_v48, %v563_v47  ;;  %v1480_v52 = vpack.c.bf16 %v566_v51, %v565_v50  ;;  %v1116_v55 = vld [vmem:[%s1646_s2] ss:$0 sm:$0xff] }
   0x8   :  { %1255 = vmatpush3.bf16.msk.msra.mxu0 %vm1251_vm4, %v1250_v21  ;;  %v84_v27 = vsel %vm74_vm0, %v81_v22, %v83_v25  ;;  %v82_v28 = vsel %vm74_vm0, %v80_v26, %v81_v22  ;;  %1256 = vmatprep.subr.bf16.mxu1 %v1347_v46  ;;  %vm1348_vm8 = vmmov 0   ;;  %v1349_v53 = vmov 0.0  }
   0x9   :  { %87 = vrot.lane.b32.xlu1 %v79_v18, %s1344_s14  ;;  %64 = vrot.lane.b32.xlu0 %v56_v19, %s1345_s15  ;;  %v1351_v59 = vmov 1983009808   ;;  %vm310_vm9 = vcmask 58368   ;;  %vm463_vm10 = vcmask 1041409   ;;  %vm465_vm11 = vcmask 1042434  }
   0xa   :  { %1262 = vmatprep.subr.bf16.mxu0 %v1347_v46  ;;  %v228_v60 = vunpack.c.l.s4 %v1351_v59  ;;  %vm467_vm12 = vcmask 1043459   ;;  %vm469_vm13 = vcmask 1044484   ;;  %vm471_vm14 = vcmask 1045509  }
   0xb   :  { %vm473_vm15 = vcmask 1046534   ;;  %vm475_vm0 = vcmask 1047559   ;;  %vm569_vm1 = vcmask 261120   ;;  %vm1080_vm2 = vcmask 1040384  }
   0xc   :  { %v229_v63 = vunpack.c.0.s8 %v228_v60  ;;  %vm1097_vm3 = vcmask 254976   ;;  %vm1110_vm4 = vcmask 1024  }
   0xd   :  { %68 = vrot.lane.b32.xlu1 %v61_v23, %s1345_s15  ;;  %66 = vrot.lane.b32.xlu0 %v59_v24, %s1345_s15 }
  0x11   :  { %91 = vrot.lane.b32.xlu1 %v84_v27, %s1344_s14  ;;  %89 = vrot.lane.b32.xlu0 %v82_v28, %s1344_s14 }
  0x15   :  { %652 = vrot.lane.b32.xlu1 %v568_v54, %s1350_s25 }
  0x77   :  { %v86_v29 = vpop.permute.xlu1 %85  ;;  %v63_v30 = vpop.permute.xlu0 %62 }
  0x78   :  { %v98_v31 = vsel %vm97_vm5, %v39_v0, %v63_v30  ;;  %v231_v0 = vshrl.u32 %v230_v61, 7 }
  0x79   :  { %v103_v32 = vsel %vm102_vm6, %v98_v31, %v86_v29 }
  0x7a   :  { %1184 = vmatprep.mubr.msk.f32.mxu0 %vm116_vm7, %v103_v32  ;;  %v232_v4 = vsub.s32 %v229_v63, %v231_v0 }
  0x7b   :  { %v88_v33 = vpop.permute.xlu1 %87  ;;  %v65_v34 = vpop.permute.xlu0 %64 }
  0x7c   :  { %v99_v35 = vsel %vm97_vm5, %v40_v1, %v65_v34 }
  0x7d   :  { %v104_v36 = vsel %vm102_vm6, %v99_v35, %v88_v33 }
  0x7e   :  { %1185 = vmatmul.mubr.msk.f32.vlgmr.msra.gmra.mrb[0].mxu0 %vm116_vm7, %v104_v36 }
  0x7f   :  { %v69_v37 = vpop.permute.xlu1 %68  ;;  %v67_v38 = vpop.permute.xlu0 %66  ;;  %1264 = vmatpush3.bf16.msra.mxu0 %v1470_v49 }
  0x80   :  { %v101_v39 = vsel %vm97_vm5, %v43_v7, %v69_v37  ;;  %v100_v40 = vsel %vm97_vm5, %v42_v8, %v67_v38  ;;  %1265 = vmatprep.subr.bf16.mxu0 %v1347_v46 }
  0x83   :  { %v92_v41 = vpop.permute.xlu1 %91  ;;  %v90_v42 = vpop.permute.xlu0 %89  ;;  %1267 = vmatpush3.bf16.msra.mxu0 %v1480_v52 }
  0x84   :  { %v106_v43 = vsel %vm102_vm6, %v101_v39, %v92_v41  ;;  %v105_v44 = vsel %vm102_vm6, %v100_v40, %v90_v42  ;;  %1276 = vmatprep.subr.bf16.mxu0 %v1347_v46 }
  0x85   :  { %1187 = vmatprep.mubr.msk.f32.mxu0 %vm116_vm7, %v105_v44 }
  0x86   :  { %1188 = vmatmul.mubr.msk.f32.gmra.mrb[2].mxu0 %vm116_vm7, %v106_v43 }
  0x87   :  { %1214 = vmatprep.mubr.msk.f32.mxu0 %vm1348_vm8, %v1349_v53 }
 0x151   :  { %v1186_v56 = vpop.f32.mrb[0].mxu0 }
 0x152   :  { %v205_v57 = vadd.f32 %v1186_v56, %v1116_v55  ;;  %v199_v58 = vpop.f32.mrb[1].mxu0 }
 0x153   :  { %v200_v62 = vadd.f32 %v1116_v55, %v199_v58 }
 0x154   :  { %1298 = vtanh.f32 %v205_v57 }
 0x155   :  { %1300 = vtanh.f32 %v200_v62 }
 0x159   :  { %v1189_v1 = vpop.f32.mrb[2].mxu0 }
 0x15a   :  { %v215_v2 = vadd.f32 %v1189_v1, %v1116_v55  ;;  %v209_v3 = vpop.f32.mrb[3].mxu0 }
 0x15b   :  { %v210_v5 = vadd.f32 %v1116_v55, %v209_v3 }
 0x15c   :  { %1302 = vtanh.f32 %v215_v2 }
 0x15d   :  { %1304 = vtanh.f32 %v210_v5 }
 0x15e   :  { %v1299_v6 = vpop.eup %1298 }
 0x15f   :  { %v1301_v7 = vpop.eup %1300  ;;  %v243_v8 = vcombine.high %v1299_v6, %v1299_v6  ;;  %v250_v9 = vrot.slane %v1299_v6, %v232_v4 }
 0x160   :  { %v226_v10 = vcombine.high %v1301_v7, %v1301_v7  ;;  %v233_v11 = vrot.slane %v1301_v7, %v232_v4 }
 0x161   :  { %v257_v12 = vrot.slane %v243_v8, %v232_v4  ;;  %v258_v13 = vcombine.high %v250_v9, %v250_v9  ;;  %v339_v14 = vsel %vm310_vm9, %v250_v9, -inf }
 0x162   :  { %v340_v15 = vrot.slane %v339_v14, 4  ;;  %v240_v16 = vrot.slane %v226_v10, %v232_v4  ;;  %v241_v17 = vcombine.high %v233_v11, %v233_v11  ;;  %v311_v18 = vsel %vm310_vm9, %v233_v11, -inf }
 0x163   :  { %v312_v19 = vrot.slane %v311_v18, 4  ;;  %v259_v20 = vcombine.high %v257_v12, %v257_v12  ;;  %v1496_v21 = vsel %vm310_vm9, %v258_v13, -inf  ;;  %v1499_v22 = vsel %vm310_vm9, %v257_v12, -inf }
 0x164   :  { %v1501_v23 = vmax.f32 %v339_v14, %v340_v15  ;;  %v242_v24 = vcombine.high %v240_v16, %v240_v16  ;;  %v318_v25 = vsel %vm310_vm9, %v241_v17, -inf  ;;  %v325_v26 = vsel %vm310_vm9, %v240_v16, -inf }
 0x165   :  { %v313_v27 = vmax.f32 %v311_v18, %v312_v19  ;;  %v319_v28 = vrot.slane %v318_v25, 4  ;;  %v326_v29 = vrot.slane %v325_v26, 4  ;;  %v347_v30 = vrot.slane %v1496_v21, 4 }
 0x166   :  { %v1303_v31 = vpop.eup %1302  ;;  %v332_v32 = vsel %vm310_vm9, %v242_v24, -inf  ;;  %v342_v33 = vrot.slane %v1501_v23, 2  ;;  %v354_v34 = vrot.slane %v1499_v22, 4  ;;  %v1510_v35 = vsel %vm310_vm9, %v259_v20, -inf }
 0x167   :  { %v1305_v36 = vpop.eup %1304  ;;  %v314_v37 = vrot.slane %v313_v27, 2  ;;  %v320_v38 = vmax.f32 %v318_v25, %v319_v28  ;;  %v327_v39 = vmax.f32 %v325_v26, %v326_v29  ;;  %v333_v40 = vrot.slane %v332_v32, 4 }
 0x168   :  { %v277_v41 = vcombine.high %v1303_v31, %v1303_v31  ;;  %v284_v42 = vrot.slane %v1303_v31, %v232_v4  ;;  %v260_v43 = vcombine.high %v1305_v36, %v1305_v36  ;;  %v267_v44 = vrot.slane %v1305_v36, %v232_v4 }
 0x169   :  { %v315_v45 = vmax.f32 %v313_v27, %v314_v37  ;;  %v321_v47 = vrot.slane %v320_v38, 2  ;;  %v328_v48 = vrot.slane %v327_v39, 2  ;;  %v334_v50 = vmax.f32 %v332_v32, %v333_v40 }
 0x16a   :  { %v1512_v51 = vrot.slane %v277_v41, %v232_v4  ;;  %v292_v54 = vcombine.high %v284_v42, %v284_v42  ;;  %v395_v55 = vsel %vm310_vm9, %v284_v42, -inf  ;;  %v274_v56 = vrot.slane %v260_v43, %v232_v4 }
 0x16b   :  { %v316_v57 = vrot.slane %v315_v45, 1  ;;  %v322_v58 = vmax.f32 %v320_v38, %v321_v47  ;;  %v396_v59 = vrot.slane %v395_v55, 4  ;;  %v275_v60 = vcombine.high %v267_v44, %v267_v44 }
 0x16c   :  { %v1516_v61 = vsel %vm310_vm9, %v292_v54, -inf  ;;  %v276_v62 = vcombine.high %v274_v56, %v274_v56  ;;  %v367_v63 = vsel %vm310_vm9, %v267_v44, -inf  ;;  %v381_v0 = vsel %vm310_vm9, %v274_v56, -inf }
 0x16d   :  { %v397_v1 = vmax.f32 %v395_v55, %v396_v59  ;;  %v403_v2 = vrot.slane %v1516_v61, 4  ;;  %v368_v3 = vrot.slane %v367_v63, 4  ;;  %v374_v5 = vsel %vm310_vm9, %v275_v60, -inf }
 0x16e   :  { %v375_v6 = vrot.slane %v374_v5, 4  ;;  %v382_v4 = vrot.slane %v381_v0, 4  ;;  %v388_v7 = vsel %vm310_vm9, %v276_v62, -inf  ;;  %v317_v8 = vmax.f32 %v315_v45, %v316_v57 }
 0x16f   :  { %v398_v9 = vrot.slane %v397_v1, 2  ;;  %v369_v10 = vmax.f32 %v367_v63, %v368_v3  ;;  %v389_v11 = vrot.slane %v388_v7, 4  ;;  %v323_v12 = vrot.slane %v322_v58, 1 }
 0x170   :  { %v376_v13 = vmax.f32 %v374_v5, %v375_v6  ;;  %v383_v14 = vmax.f32 %v381_v0, %v382_v4  ;;  %v329_v15 = vmax.f32 %v327_v39, %v328_v48  ;;  %v335_v16 = vrot.slane %v334_v50, 2 }
 0x171   :  { %v1523_v17 = vmax.f32 %v397_v1, %v398_v9  ;;  %v370_v18 = vrot.slane %v369_v10, 2  ;;  %v390_v19 = vmax.f32 %v388_v7, %v389_v11  ;;  %v324_v20 = vmax.f32 %v322_v58, %v323_v12 }
 0x172   :  { %v377_v24 = vrot.slane %v376_v13, 2  ;;  %v384_v25 = vrot.slane %v383_v14, 2  ;;  %v330_v26 = vrot.slane %v329_v15, 1  ;;  %v336_v27 = vmax.f32 %v334_v50, %v335_v16 }
 0x173   :  { %v371_v28 = vmax.f32 %v369_v10, %v370_v18  ;;  %v391_v29 = vrot.slane %v390_v19, 2  ;;  %v343_v31 = vmax.f32 %v1501_v23, %v342_v33  ;;  %v348_v32 = vmax.f32 %v1496_v21, %v347_v30 }
 0x174   :  { %v378_v36 = vmax.f32 %v376_v13, %v377_v24  ;;  %v385_v37 = vmax.f32 %v383_v14, %v384_v25  ;;  %v331_v38 = vmax.f32 %v329_v15, %v330_v26  ;;  %v337_v39 = vrot.slane %v336_v27, 1 }
 0x175   :  { %v372_v40 = vrot.slane %v371_v28, 1  ;;  %v344_v41 = vrot.slane %v343_v31, 1  ;;  %v349_v42 = vrot.slane %v348_v32, 2  ;;  %v355_v43 = vmax.f32 %v1499_v22, %v354_v34 }
 0x176   :  { %v379_v44 = vrot.slane %v378_v36, 1  ;;  %v386_v45 = vrot.slane %v385_v37, 1  ;;  %v338_v47 = vmax.f32 %v336_v27, %v337_v39  ;;  %v361_v48 = vrot.slane %v1510_v35, 4 }
 0x177   :  { %v373_v23 = vmax.f32 %v371_v28, %v372_v40  ;;  %v345_v21 = vmax.f32 %v343_v31, %v344_v41  ;;  %v350_v30 = vmax.f32 %v348_v32, %v349_v42  ;;  %v356_v33 = vrot.slane %v355_v43, 2 }
 0x178   :  { %v380_v50 = vmax.f32 %v378_v36, %v379_v44  ;;  %v362_v54 = vmax.f32 %v1510_v35, %v361_v48  ;;  %v423_v55 = vmax.f32 %v317_v8, 0.0  ;;  %v424_v56 = vmax.f32 %v324_v20, 0.0 }
 0x179   :  { %v431_v57 = vmax.f32 %v373_v23, 0.0  ;;  %v351_v58 = vrot.slane %v350_v30, 1  ;;  %v357_v59 = vmax.f32 %v355_v43, %v356_v33  ;;  %v425_v60 = vmax.f32 %v331_v38, 0.0 }
 0x17a   :  { %v363_v22 = vrot.slane %v362_v54, 2  ;;  %v426_v34 = vmax.f32 %v338_v47, 0.0  ;;  %v427_v62 = vmax.f32 %v345_v21, 0.0  ;;  %v464_v63 = vsel %vm463_vm10, %v424_v56, %v423_v55 }
 0x17b   :  { %v352_v0 = vmax.f32 %v350_v30, %v351_v58  ;;  %v358_v1 = vrot.slane %v357_v59, 1  ;;  %v466_v3 = vsel %vm465_vm11, %v425_v60, %v464_v63  ;;  %v293_v5 = vcombine.high %v1512_v51, %v1512_v51  ;;  %v567_v60 = vld [vmem:[%s1647_s7] sm:$0xff] }
 0x17c   :  { %v364_v35 = vmax.f32 %v362_v54, %v363_v22  ;;  %v468_v6 = vsel %vm467_vm12, %v426_v34, %v466_v3  ;;  %v387_v4 = vmax.f32 %v385_v37, %v386_v45  ;;  %v392_v7 = vmax.f32 %v390_v19, %v391_v29  ;;  %v1122_v22 = vld [vmem:[%s1648_s6] ss:$0 sm:$0xff] }
 0x17d   :  { %v359_v8 = vmax.f32 %v357_v59, %v358_v1  ;;  %v428_v9 = vmax.f32 %v352_v0, 0.0  ;;  %v470_v10 = vsel %vm469_vm13, %v427_v62, %v468_v6  ;;  %v400_v11 = vrot.slane %v1523_v17, 1 }
 0x17e   :  { %v365_v12 = vrot.slane %v364_v35, 1  ;;  %v393_v13 = vrot.slane %v392_v7, 1  ;;  %v404_v14 = vmax.f32 %v1516_v61, %v403_v2  ;;  %v409_v15 = vsel %vm310_vm9, %v1512_v51, -inf }
 0x17f   :  { %v429_v16 = vmax.f32 %v359_v8, 0.0  ;;  %v472_v18 = vsel %vm471_vm14, %v428_v9, %v470_v10  ;;  %v401_v19 = vmax.f32 %v1523_v17, %v400_v11  ;;  %v410_v20 = vrot.slane %v409_v15, 4  ;;  %v653_v9 = vpop.permute.xlu1 %652 }
 0x180   :  { %v366_v24 = vmax.f32 %v364_v35, %v365_v12  ;;  %v394_v25 = vmax.f32 %v392_v7, %v393_v13  ;;  %v405_v26 = vrot.slane %v404_v14, 2  ;;  %v416_v27 = vsel %vm310_vm9, %v293_v5, -inf }
 0x181   :  { %v474_v28 = vsel %vm473_vm15, %v429_v16, %v472_v18  ;;  %v411_v29 = vmax.f32 %v409_v15, %v410_v20  ;;  %v417_v31 = vrot.slane %v416_v27, 4  ;;  %v432_v32 = vmax.f32 %v380_v50, 0.0 }
 0x182   :  { %v430_v61 = vmax.f32 %v366_v24, 0.0  ;;  %v406_v2 = vmax.f32 %v404_v14, %v405_v26  ;;  %v433_v36 = vmax.f32 %v387_v4, 0.0  ;;  %v434_v51 = vmax.f32 %v394_v25, 0.0 }
 0x183   :  { %v412_v37 = vrot.slane %v411_v29, 2  ;;  %v418_v38 = vmax.f32 %v416_v27, %v417_v31  ;;  %v477_v39 = vsel %vm463_vm10, %v432_v32, %v431_v57  ;;  %v435_v41 = vmax.f32 %v401_v19, 0.0 }
 0x184   :  { %v476_v17 = vsel %vm475_vm0, %v430_v61, %v474_v28  ;;  %v407_v40 = vrot.slane %v406_v2, 1  ;;  %v478_v42 = vsel %vm465_vm11, %v433_v36, %v477_v39  ;;  %v1133_v36 = vld [vmem:[%s1644_s5 + $0x20] sm:$0xff]  ;;  %v773_v39 = vld [vmem:[%s1649_s4 + $0x8] sm:$0xff] }
 0x185   :  { %1192 = vmatprep.mubr.msk.f32.mxu1 %vm102_vm6, %v476_v17  ;;  %v413_v43 = vmax.f32 %v411_v29, %v412_v37  ;;  %v419_v44 = vrot.slane %v418_v38, 2  ;;  %v479_v45 = vsel %vm467_vm12, %v434_v51, %v478_v42  ;;  %v1134_v51 = vld [vmem:[%s1644_s5 + $0x28] sm:$0xff]  ;;  %v1135_v37 = vld [vmem:[%s1644_s5 + $0x30] sm:$0xff]  ;;  %v775_v42 = vld [vmem:[%s1649_s4 + $0x18] sm:$0xff] }
 0x186   :  { %v408_v47 = vmax.f32 %v406_v2, %v407_v40  ;;  %v480_v48 = vsel %vm469_vm13, %v435_v41, %v479_v45  ;;  %v1277_v17 = vpack.c.bf16 %v1134_v51, %v1133_v36  ;;  %v774_v40 = vld [vmem:[%s1649_s4 + $0x10] sm:$0xff] }
 0x187   :  { %v414_v23 = vrot.slane %v413_v43, 1  ;;  %v420_v21 = vmax.f32 %v418_v38, %v419_v44  ;;  %v772_v38 = vld [vmem:[%s1649_s4] sm:$0xff]  ;;  %v1272_v44 = vpack.c.bf16 %v775_v42, %v774_v40 }
 0x188   :  { %v436_v30 = vmax.f32 %v408_v47, 0.0  ;;  %v1268_v41 = vpack.c.bf16 %v773_v39, %v772_v38 }
 0x189   :  { %v415_v33 = vmax.f32 %v413_v43, %v414_v23  ;;  %v421_v50 = vrot.slane %v420_v21, 1  ;;  %v1136_v43 = vld [vmem:[%s1644_s5 + $0x38] sm:$0xff] }
 0x18a   :  { %v481_v54 = vsel %vm471_vm14, %v436_v30, %v480_v48  ;;  %v1280_v45 = vpack.c.bf16 %v1136_v43, %v1135_v37  ;;  %v1137_v48 = vld [vmem:[%s1647_s7 + $0x8] sm:$0xff]  ;;  %v1102_v37 = vstv %s1651_s10 }
 0x18b   :  { %v422_v55 = vmax.f32 %v420_v21, %v421_v50  ;;  %v437_v56 = vmax.f32 %v415_v33, 0.0  ;;  %v1138_v30 = vld [vmem:[%s1645_s8 + $0x8] sm:$0xff] }
 0x18d   :  { %v438_v57 = vmax.f32 %v422_v55, 0.0  ;;  %v482_v58 = vsel %vm473_vm15, %v437_v56, %v481_v54  ;;  %v1130_v55 = vld [vmem:[%s1648_s6 + $0x1] ss:$0 sm:$0xff] }
 0x18f   :  { %v483_v59 = vsel %vm475_vm0, %v438_v57, %v482_v58 }
 0x190   :  { %1193 = vmatmul.mubr.msk.f32.vlgmr.msra.gmra.mrb[0].mxu1 %vm102_vm6, %v483_v59 }
 0x191   :  { %1258 = vmatpush3.bf16.msra.mxu1 %v1470_v49  ;;  %1203 = vmatprep.mubr.msk.f32.mxu1 %vm1348_vm8, %v1349_v53 }
 0x192   :  { %1259 = vmatprep.subr.bf16.mxu1 %v1347_v46 }
 0x195   :  { %1261 = vmatpush3.bf16.msra.mxu1 %v1480_v52 }
 0x196   :  { %1269 = vmatprep.subr.bf16.mxu1 %v1268_v41 }
 0x198   :  { %1204 = vmatmul.mubr.msk.f32.vlgmr.msra.gmra.mrb[2].mxu1 %vm569_vm1, %v567_v60 }
 0x199   :  { %1271 = vmatpush3.bf16.msra.mxu1 %v1268_v41 }
 0x19a   :  { %1273 = vmatprep.subr.bf16.mxu1 %v1272_v44 }
 0x19d   :  { %1275 = vmatpush3.bf16.msra.mxu1 %v1272_v44 }
 0x19e   :  { %1282 = vmatprep.subr.bf16.mxu1 %v1347_v46 }
 0x263   :  { %v1194_v34 = vpop.f32.mrb[0].mxu1 }
 0x264   :  { %v560_v49 = vadd.f32 %v1194_v34, %v1122_v22  ;;  %v554_v62 = vpop.f32.mrb[1].mxu1 }
 0x265   :  { %v555_v63 = vadd.f32 %v1122_v22, %v554_v62 }
 0x26b   :  { %v639_v0 = vpop.f32.mrb[2].mxu1 }
 0x26c   :  { %v643_v1 = vadd.f32 %v639_v0, %v555_v63  ;;  %v1205_v3 = vpop.f32.mrb[3].mxu1 }
 0x26e   :  { %1306 = vtanh.f32 %v643_v1  ;;  %v1126_v5 = vmul.f32 -1.442695, %v643_v1 }
 0x270   :  { %1308 = vpow2.f32 %v1126_v5 }
 0x278   :  { %v1307_v52 = vpop.eup %1306 }
 0x279   :  { %657 = vrot.lane.b32.xlu0 %v1307_v52, %s1352_s12 }
 0x27a   :  { %v1309_v35 = vpop.eup %1308 }
 0x27b   :  { %v647_v6 = vadd.f32 1.0, %v1309_v35 }
 0x27d   :  { %1310 = vrcp.f32 %v647_v6 }
 0x287   :  { %v1311_v4 = vpop.eup %1310 }
 0x288   :  { %v655_v10 = vmul.f32 %v1311_v4, %v653_v9 }
 0x2eb   :  { %v658_v7 = vpop.permute.xlu0 %657 }
 0x2ec   :  { %v660_v8 = vmul.f32 %v1311_v4, %v658_v7 }
 0x2ee   :  { %662 = vrot.lane.b32.xlu0 %v660_v8, %s1350_s25 }
 0x360   :  { %v663_v11 = vpop.permute.xlu0 %662 }
 0x361   :  { %v665_v12 = vadd.f32 %v663_v11, %v655_v10 }
 0x363   :  { %1312 = vtanh.f32 %v665_v12 }
 0x36d   :  { %v1313_v13 = vpop.eup %1312 }
 0x36e   :  { %668 = vrot.lane.b32.xlu1 %v1313_v13, %s1352_s12 }
 0x3e0   :  { %v669_v14 = vpop.permute.xlu1 %668 }
 0x3e1   :  { %v671_v15 = vmul.f32 %v1311_v4, %v669_v14 }
 0x3e3   :  { %673 = vrot.lane.b32.xlu0 %v671_v15, %s1350_s25 }
 0x455   :  { %v674_v16 = vpop.permute.xlu0 %673 }
 0x456   :  { %1215 = vmatmul.mubr.msk.f32.vlgmr.msra.gmra.mrb[4].mxu0 %vm569_vm1, %v674_v16  ;;  %1225 = vmatprep.mubr.msk.f32.mxu1 %vm569_vm1, %v674_v16 }
 0x457   :  { %1236 = vmatprep.mubr.msk.f32.mxu0 %vm1348_vm8, %v1349_v53  ;;  %1278 = vmatpush3.bf16.msra.mxu0 %v1277_v17 }
 0x458   :  { %1279 = vmatprep.subr.bf16.mxu0 %v1347_v46 }
 0x45b   :  { %1281 = vmatpush3.bf16.msra.mxu0 %v1280_v45 }
 0x45e   :  { %1237 = vmatmul.mubr.msk.f32.vlgmr.msra.gmra.mrb[6].mxu0 %vm569_vm1, %v1137_v48 }
 0x529   :  { %v743_v18 = vpop.f32.mrb[4].mxu0 }
 0x52a   :  { %v747_v19 = vadd.f32 %v743_v18, %v560_v49  ;;  %v1216_v20 = vpop.f32.mrb[5].mxu0  ;;  %v1143_v18 = vld [vmem:[%s1650_s9] ss:$0 sm:$0xff] }
 0x52c   :  { %1314 = vtanh.f32 %v747_v19  ;;  %v1128_v25 = vmul.f32 -1.442695, %v747_v19 }
 0x52e   :  { %1316 = vpow2.f32 %v1128_v25 }
 0x531   :  { %v942_v50 = vpop.f32.mrb[6].mxu0 }
 0x532   :  { %v1238_v54 = vpop.f32.mrb[7].mxu0 }
 0x536   :  { %v1315_v24 = vpop.eup %1314 }
 0x537   :  { %757 = vrot.lane.b32.xlu1 %v1315_v24, %s1352_s12 }
 0x538   :  { %v1317_v26 = vpop.eup %1316 }
 0x539   :  { %v751_v27 = vadd.f32 1.0, %v1317_v26 }
 0x53b   :  { %1318 = vrcp.f32 %v751_v27 }
 0x545   :  { %v1319_v28 = vpop.eup %1318 }
 0x546   :  { %v755_v32 = vmul.f32 %v1319_v28, %v665_v12 }
 0x5a9   :  { %v758_v29 = vpop.permute.xlu1 %757 }
 0x5aa   :  { %v760_v31 = vmul.f32 %v1319_v28, %v758_v29 }
 0x5ac   :  { %762 = vrot.lane.b32.xlu0 %v760_v31, %s1350_s25 }
 0x61e   :  { %v763_v61 = vpop.permute.xlu0 %762 }
 0x61f   :  { %v765_v2 = vadd.f32 %v763_v61, %v755_v32 }
 0x621   :  { %1320 = vtanh.f32 %v765_v2 }
 0x62b   :  { %v1321_v47 = vpop.eup %1320 }
 0x62c   :  { %768 = vrot.lane.b32.xlu1 %v1321_v47, %s1352_s12 }
 0x69e   :  { %v769_v23 = vpop.permute.xlu1 %768 }
 0x69f   :  { %v771_v21 = vmul.f32 %v1319_v28, %v769_v23 }
 0x6a1   :  { %785 = vrot.lane.b32.xlu0 %v771_v21, %s1350_s25 }
 0x6a5   :  { %955 = vrot.lane.b32.xlu0 %v1138_v30, %s1350_s25 }
 0x713   :  { %v786_v33 = vpop.permute.xlu0 %785 }
 0x714   :  { %1226 = vmatmul.mubr.msk.f32.vlgmr.msra.gmra.mrb[4].mxu1 %vm569_vm1, %v786_v33 }
 0x715   :  { %1284 = vmatpush3.bf16.msra.mxu1 %v1277_v17  ;;  %1247 = vmatprep.mubr.msk.f32.mxu1 %vm1348_vm8, %v1349_v53 }
 0x716   :  { %1285 = vmatprep.subr.bf16.mxu1 %v1347_v46 }
 0x717   :  { %v956_v0 = vpop.permute.xlu0 %955 }
 0x719   :  { %1287 = vmatpush3.bf16.msra.mxu1 %v1280_v45 }
 0x7e7   :  { %v1227_v56 = vpop.f32.mrb[4].mxu1 }
 0x7e8   :  { %v861_v57 = vadd.f32 %v1227_v56, %v1130_v55  ;;  %v855_v58 = vpop.f32.mrb[5].mxu1 }
 0x7e9   :  { %v856_v59 = vadd.f32 %v1130_v55, %v855_v58 }
 0x7eb   :  { %v946_v60 = vadd.f32 %v942_v50, %v856_v59 }
 0x7ed   :  { %1322 = vtanh.f32 %v946_v60  ;;  %v1140_v34 = vmul.f32 -1.442695, %v946_v60 }
 0x7ef   :  { %1324 = vpow2.f32 %v1140_v34 }
 0x7f7   :  { %v1323_v22 = vpop.eup %1322 }
 0x7f8   :  { %960 = vrot.lane.b32.xlu1 %v1323_v22, %s1352_s12 }
 0x7f9   :  { %v1325_v53 = vpop.eup %1324 }
 0x7fa   :  { %v950_v46 = vadd.f32 1.0, %v1325_v53 }
 0x7fc   :  { %1326 = vrcp.f32 %v950_v46 }
 0x806   :  { %v1327_v49 = vpop.eup %1326 }
 0x807   :  { %v958_v1 = vmul.f32 %v1327_v49, %v956_v0 }
 0x86a   :  { %v961_v62 = vpop.permute.xlu1 %960 }
 0x86b   :  { %v963_v63 = vmul.f32 %v1327_v49, %v961_v62 }
 0x86d   :  { %965 = vrot.lane.b32.xlu1 %v963_v63, %s1350_s25 }
 0x8df   :  { %v966_v3 = vpop.permute.xlu1 %965 }
 0x8e0   :  { %v968_v52 = vadd.f32 %v966_v3, %v958_v1 }
 0x8e2   :  { %1328 = vtanh.f32 %v968_v52 }
 0x8ec   :  { %v1329_v5 = vpop.eup %1328 }
 0x8ed   :  { %971 = vrot.lane.b32.xlu0 %v1329_v5, %s1352_s12 }
 0x95f   :  { %v972_v35 = vpop.permute.xlu0 %971 }
 0x960   :  { %v974_v6 = vmul.f32 %v1327_v49, %v972_v35 }
 0x962   :  { %976 = vrot.lane.b32.xlu1 %v974_v6, %s1350_s25  ;;  %v1075_v28 = vrot.slane %v974_v6, 7 }
 0x9d4   :  { %v977_v4 = vpop.permute.xlu1 %976 }
 0x9d5   :  { %1248 = vmatmul.mubr.msk.f32.vlgmr.msra.gmra.mrb[6].mxu1 %vm569_vm1, %v977_v4 }
 0xaa8   :  { %v1046_v7 = vpop.f32.mrb[6].mxu1 }
 0xaa9   :  { %v1050_v8 = vadd.f32 %v1046_v7, %v861_v57  ;;  %v1249_v9 = vpop.f32.mrb[7].mxu1 }
 0xaab   :  { %1330 = vtanh.f32 %v1050_v8  ;;  %v1142_v11 = vmul.f32 -1.442695, %v1050_v8 }
 0xaad   :  { %1332 = vpow2.f32 %v1142_v11 }
 0xab5   :  { %v1331_v10 = vpop.eup %1330 }
 0xab6   :  { %1060 = vrot.lane.b32.xlu0 %v1331_v10, %s1352_s12 }
 0xab7   :  { %v1333_v12 = vpop.eup %1332 }
 0xab8   :  { %v1054_v13 = vadd.f32 1.0, %v1333_v12 }
 0xaba   :  { %1334 = vrcp.f32 %v1054_v13 }
 0xac4   :  { %v1335_v14 = vpop.eup %1334 }
 0xac5   :  { %v1058_v19 = vmul.f32 %v1335_v14, %v968_v52 }
 0xb28   :  { %v1061_v15 = vpop.permute.xlu0 %1060 }
 0xb29   :  { %v1063_v16 = vmul.f32 %v1335_v14, %v1061_v15 }
 0xb2b   :  { %1065 = vrot.lane.b32.xlu1 %v1063_v16, %s1350_s25 }
 0xb2f   :  { %1089 = vrot.lane.b32.xlu1 %v1143_v18, %s1353_s29 }
 0xb9d   :  { %v1066_v20 = vpop.permute.xlu1 %1065 }
 0xb9e   :  { %v1068_v24 = vadd.f32 %v1066_v20, %v1058_v19 }
 0xba0   :  { %1336 = vtanh.f32 %v1068_v24 }
 0xba1   :  { %v1090_v32 = vpop.permute.xlu1 %1089 }
 0xbaa   :  { %v1337_v25 = vpop.eup %1336 }
 0xbab   :  { %1071 = vrot.lane.b32.xlu0 %v1337_v25, %s1352_s12 }
 0xc1d   :  { %v1072_v26 = vpop.permute.xlu0 %1071 }
 0xc1e   :  { %v1074_v27 = vmul.f32 %v1335_v14, %v1072_v26 }
 0xc20   :  { %v1078_v29 = vrot.slane %v1074_v27, 6 }
 0xc22   :  { %v1081_v31 = vsel %vm1080_vm2, %v1075_v28, %v1078_v29 }
 0xc23   :  { %1338 = vtanh.f32 %v1081_v31 }
 0xc2d   :  { %v1339_v61 = vpop.eup %1338 }
 0xc2e   :  { %v1092_v2 = vmul.f32 %v1339_v61, %v1090_v32 }
 0xc30   :  { %1094 = vrot.lane.b32.xlu0 %v1092_v2, %s1350_s25 }
 0xca2   :  { %v1095_v36 = vpop.permute.xlu0 %1094 }
 0xca3   :  { %v1098_v51 = vsel %vm1097_vm3, %v1095_v36, 0.0 }
 0xca4   :  { %1099 = vadd.xlane.f32.xlu1 %v1098_v51 }
 0xd31   :  { %v1100_v38 = vpop.xlane.xlu1 %1099 }
 0xd32   :  { %v1103_v39 = vadd.f32 %v1102_v37, %v1100_v38 }
 0xd34   :  { %v1144_v17 = vmul.f32 -1.442695, %v1103_v39 }
 0xd36   :  { %1340 = vpow2.f32 %v1144_v17 }
 0xd40   :  { %v1341_v40 = vpop.eup %1340 }
 0xd41   :  { %v1107_v41 = vadd.f32 1.0, %v1341_v40 }
 0xd43   :  { %1342 = vrcp.f32 %v1107_v41 }
 0xd4d   :  { %v1343_v42 = vpop.eup %1342 }
 0xd4e   :  { %1111 = vst.msk [vmem:[%s1652_s11] sm:$0x3] %vm1110_vm4, %v1343_v42 }

</bundles_post_ra>
